<compile_context>
chip_gen: v7x
topology: tpu7x:2x2x1
jax: 0.10.0
libtpu: 0.0.40
codegen_flags: <defaults>
</compile_context>

<pallas_src>
import functools

import jax
import jax.numpy as jnp
from jax.experimental import pallas as pl
from jax.experimental.pallas import tpu as pltpu

_LANE = 128
_BF16_PACK = 16                      # bf16 packs 16 sublanes per vreg
_VMEM_BUDGET = 12 * 1024 * 1024      # stay under v5e's 16 MiB default scoped VMEM


def _round_up(x, m):
    return (x + m - 1) // m * m


def mlp_kernel(x_ref, w1_ref, b1_ref, w2_ref, b2_ref, o_ref):
    # lin1: bf16 MXU matmul, f32 accumulation; bias + ReLU epilogue in f32 (VPU).
    h = jnp.dot(x_ref[...], w1_ref[...], preferred_element_type=jnp.float32)
    h = jnp.maximum(h + b1_ref[...], 0.0)
    # F.dropout with training=False is identity (eval-mode forward).
    # TODO(synk): training-mode dropout (pltpu.prng_random_bits mask) not needed for eval semantics.
    # lin2: bf16 MXU matmul, f32 accumulation; bias add in f32.
    y = jnp.dot(h.astype(jnp.bfloat16), w2_ref[...],
                preferred_element_type=jnp.float32)
    # bf16 store: halves the HBM writeback of the (TB, Cp) output tile.
    o_ref[...] = (y + b2_ref[...]).astype(o_ref.dtype)


def prepare_mlp_params(w1, b1, w2, b2):
    """One-time parameter prep (hoisted out of the per-call forward).

    Pads dim and out_channels up to lane multiples (128) with zeros and casts
    weights to bf16 (MXU-native); biases stay f32 for the VPU epilogue.
    Zero padding is exact: padded h columns are relu(0 + 0) = 0 and padded w2
    rows are 0, so they contribute exactly 0.0 to the f32 accumulators.
    """
    N0, dim = w1.shape
    C = w2.shape[1]
    Dp = _round_up(dim, _LANE)
    Cp = _round_up(C, _LANE)
    w1p = jnp.zeros((N0, Dp), jnp.bfloat16).at[:, :dim].set(w1.astype(jnp.bfloat16))
    b1p = jnp.zeros((1, Dp), jnp.float32).at[:, :dim].set(
        b1.reshape(1, dim).astype(jnp.float32))
    w2p = jnp.zeros((Dp, Cp), jnp.bfloat16).at[:dim, :C].set(w2.astype(jnp.bfloat16))
    b2p = jnp.zeros((1, Cp), jnp.float32).at[:, :C].set(
        b2.reshape(1, C).astype(jnp.float32))
    return w1p, b1p, w2p, b2p, C


@functools.partial(jax.jit, static_argnames=("out_channels", "block_rows"))
def mlp_forward(x, batch, w1p, b1p, w2p, b2p, out_channels, *, block_rows=256):
    """MLP.forward (eval mode).

    x     : node features, total size B * num_nodes[0] (any leading shape).
    batch : graph-assignment vector (API parity only; its VALUES are not read --
            batch_size is derived from static shapes, avoiding a host readback.
            Equivalent to batch[-1]+1 only when every graph has num_nodes[0]
            nodes, which x.view(batch_size, -1) + Linear(num_nodes[0], dim)
            already requires).
    w1p, b1p, w2p, b2p : pre-padded/pre-cast params from prepare_mlp_params().
    """
    del batch                                          # values not needed
    N0, Dp = w1p.shape
    Cp = w2p.shape[1]
    C = out_channels
    B = x.size // N0                                   # static under jit
    x2d = x.reshape(B, N0)

    # ---- batch tiling: pad to the bf16 sublane pack (16) and pick TB so that
    #      (a) padding never balloons past ~one tile of extra rows,
    #      (b) the grid has >= 2 steps when possible (v7x megacore sharding),
    #      (c) the double-buffered working set fits the conservative VMEM budget.
    Bp = _round_up(max(B, 1), _BF16_PACK)
    n_steps = pl.cdiv(Bp, block_rows)
    if Bp > _BF16_PACK:
        n_steps = max(n_steps, 2)
    TB = _round_up(pl.cdiv(Bp, n_steps), _BF16_PACK)

    def vmem_bytes(tb):
        return (2 * tb * N0 * 2                    # x block, bf16, double-buffered
                + 2 * tb * Cp * 2                  # out block, bf16, double-buffered
                + 2 * (N0 * Dp + Dp * Cp) * 2      # w1, w2 bf16, double-buffered
                + 2 * (Dp + Cp) * 4)               # b1, b2 f32, double-buffered

    if vmem_bytes(_BF16_PACK) > _VMEM_BUDGET:
        # TODO(synk): add a K-reduction grid axis over N0 (f32 accumulator scratch,
        # pl.when init/finalize) instead of keeping w1/w2 fully VMEM-resident.
        raise ValueError(
            "MLP weights too large for the VMEM-resident Pallas kernel: "
            f"{vmem_bytes(_BF16_PACK)} bytes > {_VMEM_BUDGET} byte budget")
    while vmem_bytes(TB) > _VMEM_BUDGET and TB > _BF16_PACK:
        TB = _round_up(TB // 2, _BF16_PACK)

    n_steps = pl.cdiv(Bp, TB)
    Bp = n_steps * TB

    xb = x2d.astype(jnp.bfloat16)
    if Bp != B:
        # Padded rows produce relu(b1) @ w2 + b2 != 0 but are sliced off below.
        xb = jnp.zeros((Bp, N0), jnp.bfloat16).at[:B].set(xb)

    out = pl.pallas_call(
        mlp_kernel,
        out_shape=jax.ShapeDtypeStruct((Bp, Cp), jnp.bfloat16),
        grid=(n_steps,),
        in_specs=[
            pl.BlockSpec((TB, N0), lambda i: (i, 0)),    # x: tiled over batch
            pl.BlockSpec((N0, Dp), lambda i: (0, 0)),    # w1: VMEM-resident
            pl.BlockSpec((1, Dp), lambda i: (0, 0)),     # b1: VMEM-resident
            pl.BlockSpec((Dp, Cp), lambda i: (0, 0)),    # w2: VMEM-resident
            pl.BlockSpec((1, Cp), lambda i: (0, 0)),     # b2: VMEM-resident
        ],
        out_specs=pl.BlockSpec((TB, Cp), lambda i: (i, 0)),
        compiler_params=pltpu.CompilerParams(
            dimension_semantics=("parallel",)),          # megacore-shardable
    )(xb, w1p, b1p, w2p, b2p)

    # Slice off padding; caller-facing dtype stays f32 (tiny post-kernel upcast).
    return out[:B, :C].astype(jnp.float32)


if __name__ == "__main__":
    # Small, module-consistent shapes:
    #   num_nodes[0] = 16 (per-graph flattened input), dim = 32, out_channels = 4,
    #   batch_size = 24 (exercises a 2-step parallel grid after padding to 32 rows).
    B, N0, DIM, C = 24, 16, 32, 4

    key = jax.random.PRNGKey(0)
    k_x, k_w1, k_b1, k_w2, k_b2 = jax.random.split(key, 5)

    # Node-level input: (B * N0, 1) node features, graph-assignment vector `batch`.
    x = jax.random.normal(k_x, (B * N0, 1), dtype=jnp.float32)
    batch = jnp.repeat(jnp.arange(B, dtype=jnp.int32), N0)

    # PyTorch-Linear-style uniform init, stored transposed so the kernel does x @ W.
    bound1 = 1.0 / (N0 ** 0.5)
    w1 = jax.random.uniform(k_w1, (N0, DIM), jnp.float32, -bound1, bound1)
    b1 = jax.random.uniform(k_b1, (1, DIM), jnp.float32, -bound1, bound1)
    bound2 = 1.0 / (DIM ** 0.5)
    w2 = jax.random.uniform(k_w2, (DIM, C), jnp.float32, -bound2, bound2)
    b2 = jax.random.uniform(k_b2, (1, C), jnp.float32, -bound2, bound2)

    # One-time parameter prep (hoisted out of the per-call forward).
    w1p, b1p, w2p, b2p, out_channels = prepare_mlp_params(w1, b1, w2, b2)

    out = mlp_forward(x, batch, w1p, b1p, w2p, b2p, out_channels=out_channels)
    out = jax.block_until_ready(out)
    assert out.shape == (B, C)
    assert out.dtype == jnp.float32

    # Reference with matching bf16-operand / f32-accumulate / bf16-store math.
    x2d = x.reshape(B, -1)
    h_ref = jnp.maximum(
        jnp.dot(x2d.astype(jnp.bfloat16), w1.astype(jnp.bfloat16),
                preferred_element_type=jnp.float32) + b1, 0.0)
    y_ref = jnp.dot(h_ref.astype(jnp.bfloat16), w2.astype(jnp.bfloat16),
                    preferred_element_type=jnp.float32) + b2
    ref_match = y_ref.astype(jnp.bfloat16).astype(jnp.float32)
    assert jnp.allclose(out, ref_match, atol=1e-2, rtol=1e-2)

    # Sanity check against the pure-f32 PyTorch-equivalent forward (looser: bf16 path).
    ref_f32 = jnp.maximum(x2d @ w1 + b1, 0.0) @ w2 + b2
    assert jnp.allclose(out, ref_f32, atol=3e-2, rtol=3e-2)

    print("KERNEL_OK")
</pallas_src>

<mosaic_0001>
module attributes {stable_mosaic.version = 11 : i64} {
  func.func @mlp_kernel(%arg0: i32, %arg1: memref<16x16xbf16, #tpu.memory_space<vmem>>, %arg2: memref<16x128xbf16, #tpu.memory_space<vmem>>, %arg3: memref<1x128xf32, #tpu.memory_space<vmem>>, %arg4: memref<128x128xbf16, #tpu.memory_space<vmem>>, %arg5: memref<1x128xf32, #tpu.memory_space<vmem>>, %arg6: memref<16x128xbf16, #tpu.memory_space<vmem>>) attributes {dimension_semantics = [#tpu.dimension_semantics<parallel>], iteration_bounds = array<i64: 2>, scalar_prefetch = 0 : i64, scratch_operands = 0 : i64, tpu.core_type = #tpu.core_type<tc>, window_params = [{transform_indices = @transform_0, window_bounds = array<i64: 16, 16>}, {pipeline_mode = #tpu.pipeline_mode<synchronous>, transform_indices = @transform_1, window_bounds = array<i64: 16, 128>}, {pipeline_mode = #tpu.pipeline_mode<synchronous>, transform_indices = @transform_2, window_bounds = array<i64: 1, 128>}, {pipeline_mode = #tpu.pipeline_mode<synchronous>, transform_indices = @transform_3, window_bounds = array<i64: 128, 128>}, {pipeline_mode = #tpu.pipeline_mode<synchronous>, transform_indices = @transform_4, window_bounds = array<i64: 1, 128>}, {transform_indices = @transform_5, window_bounds = array<i64: 16, 128>}]} {
    %c0 = arith.constant 0 : index
    %c0_0 = arith.constant 0 : index
    %0 = vector.load %arg1[%c0, %c0_0] : memref<16x16xbf16, #tpu.memory_space<vmem>>, vector<16x16xbf16>
    %c0_1 = arith.constant 0 : index
    %c0_2 = arith.constant 0 : index
    %1 = vector.load %arg2[%c0_1, %c0_2] : memref<16x128xbf16, #tpu.memory_space<vmem>>, vector<16x128xbf16>
    %cst = arith.constant dense<0.000000e+00> : vector<16x128xf32>
    %2 = tpu.matmul %0, %1, %cst {dimension_numbers = #tpu.dot_dimension_numbers<[1], [0], [0], [1], [0, 0, 1, 1], [], []>} : vector<16x16xbf16>, vector<16x128xbf16>, vector<16x128xf32> -> vector<16x128xf32>
    %c0_3 = arith.constant 0 : index
    %c0_4 = arith.constant 0 : index
    %3 = vector.load %arg3[%c0_3, %c0_4] : memref<1x128xf32, #tpu.memory_space<vmem>>, vector<1x128xf32>
    %4 = vector.broadcast %3 : vector<1x128xf32> to vector<16x128xf32>
    %5 = arith.addf %2, %4 : vector<16x128xf32>
    %cst_5 = arith.constant 0.000000e+00 : f32
    %6 = vector.broadcast %cst_5 : f32 to vector<16x128xf32>
    %7 = arith.maximumf %5, %6 : vector<16x128xf32>
    %8 = arith.truncf %7 : vector<16x128xf32> to vector<16x128xbf16>
    %c0_6 = arith.constant 0 : index
    %c0_7 = arith.constant 0 : index
    %9 = vector.load %arg4[%c0_6, %c0_7] : memref<128x128xbf16, #tpu.memory_space<vmem>>, vector<128x128xbf16>
    %cst_8 = arith.constant dense<0.000000e+00> : vector<16x128xf32>
    %10 = tpu.matmul %8, %9, %cst_8 {dimension_numbers = #tpu.dot_dimension_numbers<[1], [0], [0], [1], [0, 0, 1, 1], [], []>} : vector<16x128xbf16>, vector<128x128xbf16>, vector<16x128xf32> -> vector<16x128xf32>
    %c0_9 = arith.constant 0 : index
    %c0_10 = arith.constant 0 : index
    %11 = vector.load %arg5[%c0_9, %c0_10] : memref<1x128xf32, #tpu.memory_space<vmem>>, vector<1x128xf32>
    %12 = vector.broadcast %11 : vector<1x128xf32> to vector<16x128xf32>
    %13 = arith.addf %10, %12 : vector<16x128xf32>
    %14 = arith.truncf %13 : vector<16x128xf32> to vector<16x128xbf16>
    %c0_11 = arith.constant 0 : index
    %c0_12 = arith.constant 0 : index
    %15 = vector.load %arg6[%c0_11, %c0_12] : memref<16x128xbf16, #tpu.memory_space<vmem>>, vector<16x128xbf16>
    tpu.vector_store %arg6[%c0_11, %c0_12], %14 {strides = array<i32>} : memref<16x128xbf16, #tpu.memory_space<vmem>>, vector<16x128xbf16>,
    return
  }
  func.func @transform_0(%arg0: i32) -> (i32, i32) {
    %c0_i32 = arith.constant 0 : i32
    %c0_i32_0 = arith.constant 0 : i32
    return %arg0, %c0_i32 : i32, i32
  }
  func.func @transform_1(%arg0: i32) -> (i32, i32) {
    %c0_i32 = arith.constant 0 : i32
    %c0_i32_0 = arith.constant 0 : i32
    %c0_i32_1 = arith.constant 0 : i32
    return %c0_i32, %c0_i32_0 : i32, i32
  }
  func.func @transform_2(%arg0: i32) -> (i32, i32) {
    %c0_i32 = arith.constant 0 : i32
    %c0_i32_0 = arith.constant 0 : i32
    %c0_i32_1 = arith.constant 0 : i32
    return %c0_i32, %c0_i32_0 : i32, i32
  }
  func.func @transform_3(%arg0: i32) -> (i32, i32) {
    %c0_i32 = arith.constant 0 : i32
    %c0_i32_0 = arith.constant 0 : i32
    %c0_i32_1 = arith.constant 0 : i32
    return %c0_i32, %c0_i32_0 : i32, i32
  }
  func.func @transform_4(%arg0: i32) -> (i32, i32) {
    %c0_i32 = arith.constant 0 : i32
    %c0_i32_0 = arith.constant 0 : i32
    %c0_i32_1 = arith.constant 0 : i32
    return %c0_i32, %c0_i32_0 : i32, i32
  }
  func.func @transform_5(%arg0: i32) -> (i32, i32) {
    %c0_i32 = arith.constant 0 : i32
    %c0_i32_0 = arith.constant 0 : i32
    return %arg0, %c0_i32 : i32, i32
  }
}

</mosaic_0001>

<bundles_post_ra>
// kernel: mlp_forward.1
= control target key start
LH: loop header
LB: loop body
LE: loop exit
PB: predicated region body
PF: predicated region fallthrough
CT: control target
= control target key end

     0   :  { %10 = vsyncpa [#allocation3], 0  ;;  %s684_s18 = smov 0   ;;  %s759_s0 = inlined_call_operand.vmem [shape: bf16[32,16], index: 0, kind: input, shape index: {}]   ;;  %s760_s1 = inlined_call_operand.vmem [shape: bf16[16,128], index: 1, kind: input, shape index: {}]   ;;  %s761_s2 = inlined_call_operand.vmem [shape: f32[1,128], index: 2, kind: input, shape index: {}]   ;;  %s762_s3 = inlined_call_operand.hbm [shape: bf16[128,128], index: 3, kind: input, shape index: {}]   ;;  %s763_s4 = inlined_call_operand.vmem [shape: f32[1,128], index: 4, kind: input, shape index: {}]   ;;  %s764_s5 = inlined_call_operand.vmem [shape: bf16[32,128], index: 5, kind: output, shape index: {}]  }
   0x1 LB: > { %s504_s19 = sadd.s32 4294967295, %s647_s18   ;;  %p506_p0 = scmp.ge.s32.totalorder %s647_s18, 1  ;;  %s647_s18 = sphi %s684_s18, %s16_s18  }
   0x2   : > { %p157_p1 = scmp.lt.s32.totalorder %s647_s18, 3  ;;  %s649_s20 = smov [#allocation2]  }
   0x3   : > { %s175_s21 = sshll.u32 %s649_s20, 4  ;;  %p698_p3 = scmp.eq.s32.totalorder %s504_s19, 0  ;;  %s176_s21 = int_to_ptr.vmem [resolvable:$true] %s175_s21 }
   0x4   : > { %p692_p2 = pnand %p506_p0, %p157_p1  ;;  %s609_s27 = scalar_lea.hbm %s762_s3, 1024 }
   0x5   : > { %s769_s23 = scalar_select %p698_p3, 1, 0 }
   0x6   : > { %s768_s22 = scalar_select %p692_p2, 1, 0 }
   0x7   : > { %p580_p4 = pneg %p692_p2  ;;  %p610_p6 = scmp.ne.s32.totalorder %s762_s3, %s609_s27 }
   0x8   : > { %p616_p10 = scmp.lt.u32.totalorder %s609_s27, %s762_s3 }
   0x9   : > { %p706_p5 = pnand %p698_p3, %p580_p4 }
   0xb   : > { %p611_p7 = pneg %p706_p5 }
   0xd   : > { %p612_p8 = pnand %p611_p7, %p610_p6 }
   0xf   : > { %p613_p9 = pneg %p612_p8 }
  0x11   : > { %p618_p11 = pnand %p616_p10, %p613_p9 }
  0x13   : > { %621 = shalt.err (!%p618_p11)
}
  0x14   : > { %s622_s7 = scalar_lea.vmem %s176_s21, 1024  ;;  %p630_p1 = scmp.lt.s32.totalorder %s176_s21, %s176_s21 }
  0x15   : > { %p623_p12 = scmp.ne.s32.totalorder %s176_s21, %s622_s7  ;;  %p631_p4 = scmp.lt.s32.totalorder %s622_s7, %s622_s7 }
  0x17   : > { %p625_p13 = pnand %p623_p12, %p611_p7  ;;  %p632_p3 = por %p631_p4, %p630_p1 }
  0x19   : > { %p626_p0 = pneg %p625_p13 }
  0x1b   : > { %p633_p2 = pnand %p632_p3, %p626_p0 }
  0x1d   : > { %636 = shalt.err (!%p633_p2)
}
  0x1e   : > { %s650_s8 = smov 64   ;;  %s651_s9 = smov 4  }
  0x1f   : > { %583 = dma.hbm_to_vmem [thread:$0]  (!%p706_p5), %s762_s3, 1024, %s176_s21, [#allocation3], %s650_s8, %s650_s8, %s651_s9  }
  0x20   : > { %p771_p6 = scmp.ne.s32.totalorder %s768_s22, 0 }
  0x21   : > { %p772_p8 = scmp.ne.s32.totalorder (!%p771_p6), %s769_s23, 0 }
  0x22   : > { %203 = sbr.rel (%p771_p6) target bundleno = 488 (0x1e8), region = 40 }
  0x29   : > { %642 = dma.done.wait (%p772_p8), [#allocation3], 1024  }
  0x2a   : > { %644 = vsyncadd (%p772_p8), [#allocation3], 4294966272  ;;  %s511_s12 = sshll.u32 %s504_s19, 1  ;;  %v652_v0 = vmov 0.0   ;;  %vm653_vm0 = vmmov 0   ;;  %v599_v1 = vld [vmem:[%s760_s1] sm:$0xff]  }
  0x2b   : > { %550 = vmatprep.subr.bf16.mxu0 %v652_v0  ;;  %552 = vmatprep.mubr.msk.bf16.mxu0 %vm653_vm0, %v652_v0  ;;  %p232_p2 = scmp.lt.s32.totalorder %s511_s12, 3  ;;  %vm266_vm1 = vcmask 130048   ;;  %v601_v3 = vld [vmem:[#allocation2] sm:$0xff]   ;;  %v602_v4 = vld [vmem:[#allocation2 + $0x8] sm:$0xff]   ;;  %v603_v5 = vld [vmem:[#allocation2 + $0x10] sm:$0xff]  }
  0x2c   : > { %556 = vmatprep.subr.bf16.mxu1 %v652_v0  ;;  %572 = vmatprep.mubr.msk.bf16.mxu1 %vm653_vm0, %v652_v0  ;;  %v604_v6 = vld [vmem:[#allocation2 + $0x18] sm:$0xff]   ;;  %v605_v7 = vld [vmem:[#allocation2 + $0x20] sm:$0xff]   ;;  %v606_v8 = vld [vmem:[#allocation2 + $0x28] sm:$0xff]  }
  0x2d   : > { %s774_s12 = smov (!%p232_p2, %s511_s12), 3  ;;  %551 = vmatpush3.bf16.msra.mxu0 %v599_v1  ;;  %557 = vmatpush3.bf16.msra.mxu1 %v601_v3  ;;  %v607_v9 = vld [vmem:[#allocation2 + $0x30] sm:$0xff]   ;;  %v608_v10 = vld [vmem:[#allocation2 + $0x38] sm:$0xff]   ;;  %v515_v11 = vld [vmem:[%s761_s2] ss:$0 sm:$0xff] }
  0x2e   : > { %s512_s13 = sshll.u32 %s774_s12, 2  ;;  %558 = vmatprep.subr.bf16.mxu1 %v652_v0  ;;  %v519_v21 = vld [vmem:[%s763_s4] ss:$0 sm:$0xff] }
  0x2f   : > { %s235_s16 = scalar_lea.vmem %s759_s0, %s512_s13  ;;  %s241_s26 = scalar_lea.vmem %s764_s5, %s512_s13 }
  0x30   : > { %v600_v2 = vld [vmem:[%s235_s16] sm:$0xff]  }
  0x31   : > { %553 = vmatmul.mubr.msk.bf16.vlgmr.msra.gmra.mrb[0].mxu0 %vm266_vm1, %v600_v2  ;;  %559 = vmatpush3.bf16.msra.mxu1 %v602_v4 }
  0x32   : > { %560 = vmatprep.subr.bf16.mxu1 %v652_v0 }
  0x35   : > { %561 = vmatpush3.bf16.msra.mxu1 %v603_v5 }
  0x36   : > { %562 = vmatprep.subr.bf16.mxu1 %v652_v0 }
  0x39   : > { %563 = vmatpush3.bf16.msra.mxu1 %v604_v6 }
  0x3a   : > { %564 = vmatprep.subr.bf16.mxu1 %v652_v0 }
  0x3d   : > { %565 = vmatpush3.bf16.msra.mxu1 %v605_v7 }
  0x3e   : > { %566 = vmatprep.subr.bf16.mxu1 %v652_v0 }
  0x41   : > { %567 = vmatpush3.bf16.msra.mxu1 %v606_v8 }
  0x42   : > { %568 = vmatprep.subr.bf16.mxu1 %v652_v0 }
  0x45   : > { %569 = vmatpush3.bf16.msra.mxu1 %v607_v9 }
  0x46   : > { %570 = vmatprep.subr.bf16.mxu1 %v652_v0 }
  0x49   : > { %571 = vmatpush3.bf16.msra.mxu1 %v608_v10 }
 0x104   : > { %v304_v12 = vpop.f32.mrb[0].mxu0 }
 0x105   : > { %v305_v13 = vadd.f32 %v515_v11, %v304_v12  ;;  %v554_v14 = vpop.f32.mrb[1].mxu0 }
 0x106   : > { %v307_v15 = vpop.f32.mrb[2].mxu0 }
 0x107   : > { %v308_v16 = vadd.f32 %v515_v11, %v307_v15  ;;  %v555_v17 = vpop.f32.mrb[3].mxu0  ;;  %v311_v18 = vmax.f32 %v305_v13, 0.0 }
 0x109   : > { %v312_v19 = vmax.f32 %v308_v16, 0.0 }
 0x10b   : > { %v313_v20 = vpack.c.bf16 %v312_v19, %v311_v18 }
 0x10d   : > { %573 = vmatmul.mubr.bf16.vlgmr.msra.gmra.mrb[0].mxu1 %v313_v20 }
 0x1e0   : > { %v419_v22 = vpop.f32.mrb[0].mxu1 }
 0x1e1   : > { %v574_v23 = vpop.f32.mrb[1].mxu1  ;;  %v420_v25 = vadd.f32 %v519_v21, %v419_v22 }
 0x1e2   : > { %v422_v24 = vpop.f32.mrb[2].mxu1 }
 0x1e3   : > { %v423_v26 = vadd.f32 %v519_v21, %v422_v24  ;;  %v575_v27 = vpop.f32.mrb[3].mxu1 }
 0x1e5   : > { %v537_v28 = vpack.c.bf16 %v423_v26, %v420_v25 }
 0x1e7   : > { %538 = vst [vmem:[%s241_s26] sm:$0xff] %v537_v28  }
 0x1e8 PF: > { %s16_s18 = sadd.s32 1, %s647_s18  }
 0x1e9   : > { %p13_p3 = scmp.ge.s32.totalorder %s16_s18, 4  }
 0x1eb   :  { %15 = sbr.rel (!%p13_p3) target bundleno = 1 (0x1), region = 75 }
 0x1f2   :  { %458 = vsyncpa [#allocation3], 1 }
 0x1f3   :  { %460 = vsyncpa [#allocation3 + $0x1], 1 }

</bundles_post_ra>
